<compile_context>
chip_gen: v7x
topology: tpu7x:2x2x1
jax: 0.10.0
libtpu: 0.0.40
codegen_flags: <defaults>
</compile_context>

<pallas_src>
import jax
import jax.numpy as jnp
from jax import lax
from jax.experimental import pallas as pl
from jax.experimental.pallas import tpu as pltpu


def _band_matrices(w_oihw, W):
    """Fold 3x3 taps + column reflect-pad(1) into (3, W*Ci, W*Co) band matrices."""
    Co, Ci, KH, KW = w_oihw.shape
    Wp = W + 2
    w_hwio = jnp.transpose(w_oihw, (2, 3, 1, 0)).astype(jnp.float32)  # (kh,kw,ci,co)

    # Column reflect-pad as a selection matrix P: (W*Ci, Wp*Ci).
    S = jnp.zeros((W, Wp), jnp.float32)
    S = S.at[jnp.arange(W), jnp.arange(1, W + 1)].set(1.0)   # interior pixels
    S = S.at[1, 0].set(1.0)                                  # left reflection
    S = S.at[W - 2, W + 1].set(1.0)                          # right reflection
    P = jnp.kron(S, jnp.eye(Ci, dtype=jnp.float32))

    mats = []
    for dy in range(KH):
        M = jnp.zeros((Wp * Ci, W * Co), jnp.float32)
        for dx in range(KW):
            M = M + jnp.kron(jnp.eye(Wp, W, k=-dx, dtype=jnp.float32),
                             w_hwio[dy, dx])
        mats.append(P @ M)          # (W*Ci, W*Co)
    return jnp.stack(mats)          # (3, W*Ci, W*Co)


def _row_reflect_matrices(H):
    """Row shift + row reflect-pad(1) as (3, H, H) selection matrices."""
    R0 = jnp.eye(H, k=-1, dtype=jnp.float32).at[0, 1].set(1.0)
    R1 = jnp.eye(H, dtype=jnp.float32)
    R2 = jnp.eye(H, k=1, dtype=jnp.float32).at[H - 1, H - 2].set(1.0)
    return jnp.stack([R0, R1, R2])


def _resblock_kernel(x_ref, r_ref, a1_ref, b1_ref, alpha_ref, a2_ref, b2_ref, o_ref):
    xi = x_ref[0]                       # (H, W*C) f32 -- conv1 input & residual
    alpha = alpha_ref[0]                # PReLU slope (scalar in SMEM)

    # conv1 (reflect-pad 3x3) + bias + PReLU
    acc = jnp.dot(r_ref[0],
                  jnp.dot(xi, a1_ref[0], preferred_element_type=jnp.float32),
                  preferred_element_type=jnp.float32)
    for dy in (1, 2):
        acc = acc + jnp.dot(
            r_ref[dy],
            jnp.dot(xi, a1_ref[dy], preferred_element_type=jnp.float32),
            preferred_element_type=jnp.float32)
    mid = acc + b1_ref[...]
    mid = jnp.where(mid >= 0.0, mid, alpha * mid)

    # conv2 (reflect-pad 3x3) + bias, scale by 0.1, add residual
    acc2 = jnp.dot(r_ref[0],
                   jnp.dot(mid, a2_ref[0], preferred_element_type=jnp.float32),
                   preferred_element_type=jnp.float32)
    for dy in (1, 2):
        acc2 = acc2 + jnp.dot(
            r_ref[dy],
            jnp.dot(mid, a2_ref[dy], preferred_element_type=jnp.float32),
            preferred_element_type=jnp.float32)
    out = (acc2 + b2_ref[...]) * jnp.float32(0.1) + xi
    o_ref[0] = out.astype(o_ref.dtype)


def residual_block(x, w1, b1, alpha, w2, b2):
    """x: (N, C, H, W) NCHW; w*: (C, C, 3, 3) OIHW; b*: (C,); alpha: scalar."""
    N, C, H, W = x.shape
    WC = W * C

    # Layout plumbing (wrapper): NCHW -> lane-dense image-row slab (N, H, W*C).
    x2 = jnp.transpose(x, (0, 2, 3, 1)).reshape(N, H, WC).astype(jnp.float32)
    A1 = _band_matrices(w1, W)                          # (3, WC, WC)
    A2 = _band_matrices(w2, W)                          # (3, WC, WC)
    R = _row_reflect_matrices(H)                        # (3, H, H)
    b1r = jnp.tile(b1.astype(jnp.float32), W).reshape(1, WC)
    b2r = jnp.tile(b2.astype(jnp.float32), W).reshape(1, WC)
    alpha_arr = jnp.asarray(alpha, jnp.float32).reshape(1)

    out2 = pl.pallas_call(
        _resblock_kernel,
        out_shape=jax.ShapeDtypeStruct((N, H, WC), jnp.float32),
        grid=(N,),
        in_specs=[
            pl.BlockSpec((1, H, WC), lambda i: (i, 0, 0)),       # x (per image)
            pl.BlockSpec((3, H, H), lambda i: (0, 0, 0)),        # R row matrices
            pl.BlockSpec((3, WC, WC), lambda i: (0, 0, 0)),      # A1 band matrices
            pl.BlockSpec((1, WC), lambda i: (0, 0)),             # bias1 row
            pl.BlockSpec(memory_space=pltpu.MemorySpace.SMEM),   # PReLU alpha
            pl.BlockSpec((3, WC, WC), lambda i: (0, 0, 0)),      # A2 band matrices
            pl.BlockSpec((1, WC), lambda i: (0, 0)),             # bias2 row
        ],
        out_specs=pl.BlockSpec((1, H, WC), lambda i: (i, 0, 0)),
        compiler_params=pltpu.CompilerParams(
            dimension_semantics=("parallel",)),
    )(x2, R, A1, b1r, alpha_arr, A2, b2r)

    return jnp.transpose(out2.reshape(N, H, W, C), (0, 3, 1, 2)).astype(x.dtype)


def _reference(x, w1, b1, alpha, w2, b2):
    def conv(inp, w, b):
        pad = jnp.pad(inp, ((0, 0), (0, 0), (1, 1), (1, 1)), mode="reflect")
        out = lax.conv_general_dilated(
            pad, w, (1, 1), "VALID",
            dimension_numbers=("NCHW", "OIHW", "NCHW"),
            precision=lax.Precision.HIGHEST)
        return out + b[None, :, None, None]

    c1 = conv(x, w1, b1)
    c1 = jnp.where(c1 >= 0, c1, alpha * c1)      # PReLU (single parameter)
    c2 = conv(c1, w2, b2)
    return c2 * 0.1 + x


if __name__ == "__main__":
    key = jax.random.PRNGKey(0)
    kx, k1, k2, k3, k4 = jax.random.split(key, 5)

    N, C, H, W = 2, 4, 16, 16
    x = jax.random.normal(kx, (N, C, H, W), dtype=jnp.float32)

    bound = 1.0 / (C * 9) ** 0.5               # PyTorch Conv2d default init range
    w1 = jax.random.uniform(k1, (C, C, 3, 3), jnp.float32, -bound, bound)
    b1 = jax.random.uniform(k2, (C,), jnp.float32, -bound, bound)
    w2 = jax.random.uniform(k3, (C, C, 3, 3), jnp.float32, -bound, bound)
    b2 = jax.random.uniform(k4, (C,), jnp.float32, -bound, bound)
    alpha = 0.25                               # nn.PReLU() default init

    y = jax.block_until_ready(residual_block(x, w1, b1, alpha, w2, b2))
    ref = _reference(x, w1, b1, alpha, w2, b2)

    assert y.shape == x.shape and y.dtype == x.dtype
    assert float(jnp.max(jnp.abs(y - ref))) < 5e-3

    print("KERNEL_OK")
</pallas_src>

<mosaic_0001>
module attributes {stable_mosaic.version = 11 : i64} {
  func.func @_resblock_kernel(%arg0: i32, %arg1: memref<1x16x64xf32, #tpu.memory_space<vmem>>, %arg2: memref<3x16x16xf32, #tpu.memory_space<vmem>>, %arg3: memref<3x64x64xf32, #tpu.memory_space<vmem>>, %arg4: memref<1x64xf32, #tpu.memory_space<vmem>>, %arg5: memref<1xf32, #tpu.memory_space<smem>>, %arg6: memref<3x64x64xf32, #tpu.memory_space<vmem>>, %arg7: memref<1x64xf32, #tpu.memory_space<vmem>>, %arg8: memref<1x16x64xf32, #tpu.memory_space<vmem>>) attributes {dimension_semantics = [#tpu.dimension_semantics<parallel>], iteration_bounds = array<i64: 2>, scalar_prefetch = 0 : i64, scratch_operands = 0 : i64, tpu.core_type = #tpu.core_type<tc>, window_params = [{transform_indices = @transform_0, window_bounds = array<i64: 1, 16, 64>}, {pipeline_mode = #tpu.pipeline_mode<synchronous>, transform_indices = @transform_1, window_bounds = array<i64: 3, 16, 16>}, {pipeline_mode = #tpu.pipeline_mode<synchronous>, transform_indices = @transform_2, window_bounds = array<i64: 3, 64, 64>}, {pipeline_mode = #tpu.pipeline_mode<synchronous>, transform_indices = @transform_3, window_bounds = array<i64: 1, 64>}, {transform_indices = @transform_4, window_bounds = array<i64: 1>}, {pipeline_mode = #tpu.pipeline_mode<synchronous>, transform_indices = @transform_5, window_bounds = array<i64: 3, 64, 64>}, {pipeline_mode = #tpu.pipeline_mode<synchronous>, transform_indices = @transform_6, window_bounds = array<i64: 1, 64>}, {transform_indices = @transform_7, window_bounds = array<i64: 1, 16, 64>}]} {
    %c0 = arith.constant 0 : index
    %c0_0 = arith.constant 0 : index
    %c0_1 = arith.constant 0 : index
    %0 = vector.load %arg1[%c0, %c0_0, %c0_1] : memref<1x16x64xf32, #tpu.memory_space<vmem>>, vector<1x16x64xf32>
    %1 = vector.shape_cast %0 : vector<1x16x64xf32> to vector<16x64xf32>
    %c0_2 = arith.constant 0 : index
    %2 = memref.load %arg5[%c0_2] : memref<1xf32, #tpu.memory_space<smem>>
    %c0_3 = arith.constant 0 : index
    %c0_4 = arith.constant 0 : index
    %c0_5 = arith.constant 0 : index
    %3 = vector.load %arg2[%c0_3, %c0_4, %c0_5] : memref<3x16x16xf32, #tpu.memory_space<vmem>>, vector<1x16x16xf32>
    %4 = vector.shape_cast %3 : vector<1x16x16xf32> to vector<16x16xf32>
    %c0_6 = arith.constant 0 : index
    %c0_7 = arith.constant 0 : index
    %c0_8 = arith.constant 0 : index
    %5 = vector.load %arg3[%c0_6, %c0_7, %c0_8] : memref<3x64x64xf32, #tpu.memory_space<vmem>>, vector<1x64x64xf32>
    %6 = vector.shape_cast %5 : vector<1x64x64xf32> to vector<64x64xf32>
    %cst = arith.constant dense<0.000000e+00> : vector<16x64xf32>
    %7 = tpu.matmul %1, %6, %cst {dimension_numbers = #tpu.dot_dimension_numbers<[1], [0], [0], [1], [0, 0, 1, 1], [], []>} : vector<16x64xf32>, vector<64x64xf32>, vector<16x64xf32> -> vector<16x64xf32>
    %cst_9 = arith.constant dense<0.000000e+00> : vector<16x64xf32>
    %8 = tpu.matmul %4, %7, %cst_9 {dimension_numbers = #tpu.dot_dimension_numbers<[1], [0], [0], [1], [0, 0, 1, 1], [], []>} : vector<16x16xf32>, vector<16x64xf32>, vector<16x64xf32> -> vector<16x64xf32>
    %c1 = arith.constant 1 : index
    %c0_10 = arith.constant 0 : index
    %c0_11 = arith.constant 0 : index
    %9 = vector.load %arg2[%c1, %c0_10, %c0_11] : memref<3x16x16xf32, #tpu.memory_space<vmem>>, vector<1x16x16xf32>
    %10 = vector.shape_cast %9 : vector<1x16x16xf32> to vector<16x16xf32>
    %c1_12 = arith.constant 1 : index
    %c0_13 = arith.constant 0 : index
    %c0_14 = arith.constant 0 : index
    %11 = vector.load %arg3[%c1_12, %c0_13, %c0_14] : memref<3x64x64xf32, #tpu.memory_space<vmem>>, vector<1x64x64xf32>
    %12 = vector.shape_cast %11 : vector<1x64x64xf32> to vector<64x64xf32>
    %cst_15 = arith.constant dense<0.000000e+00> : vector<16x64xf32>
    %13 = tpu.matmul %1, %12, %cst_15 {dimension_numbers = #tpu.dot_dimension_numbers<[1], [0], [0], [1], [0, 0, 1, 1], [], []>} : vector<16x64xf32>, vector<64x64xf32>, vector<16x64xf32> -> vector<16x64xf32>
    %cst_16 = arith.constant dense<0.000000e+00> : vector<16x64xf32>
    %14 = tpu.matmul %10, %13, %cst_16 {dimension_numbers = #tpu.dot_dimension_numbers<[1], [0], [0], [1], [0, 0, 1, 1], [], []>} : vector<16x16xf32>, vector<16x64xf32>, vector<16x64xf32> -> vector<16x64xf32>
    %15 = arith.addf %8, %14 : vector<16x64xf32>
    %c2 = arith.constant 2 : index
    %c0_17 = arith.constant 0 : index
    %c0_18 = arith.constant 0 : index
    %16 = vector.load %arg2[%c2, %c0_17, %c0_18] : memref<3x16x16xf32, #tpu.memory_space<vmem>>, vector<1x16x16xf32>
    %17 = vector.shape_cast %16 : vector<1x16x16xf32> to vector<16x16xf32>
    %c2_19 = arith.constant 2 : index
    %c0_20 = arith.constant 0 : index
    %c0_21 = arith.constant 0 : index
    %18 = vector.load %arg3[%c2_19, %c0_20, %c0_21] : memref<3x64x64xf32, #tpu.memory_space<vmem>>, vector<1x64x64xf32>
    %19 = vector.shape_cast %18 : vector<1x64x64xf32> to vector<64x64xf32>
    %cst_22 = arith.constant dense<0.000000e+00> : vector<16x64xf32>
    %20 = tpu.matmul %1, %19, %cst_22 {dimension_numbers = #tpu.dot_dimension_numbers<[1], [0], [0], [1], [0, 0, 1, 1], [], []>} : vector<16x64xf32>, vector<64x64xf32>, vector<16x64xf32> -> vector<16x64xf32>
    %cst_23 = arith.constant dense<0.000000e+00> : vector<16x64xf32>
    %21 = tpu.matmul %17, %20, %cst_23 {dimension_numbers = #tpu.dot_dimension_numbers<[1], [0], [0], [1], [0, 0, 1, 1], [], []>} : vector<16x16xf32>, vector<16x64xf32>, vector<16x64xf32> -> vector<16x64xf32>
    %22 = arith.addf %15, %21 : vector<16x64xf32>
    %c0_24 = arith.constant 0 : index
    %c0_25 = arith.constant 0 : index
    %23 = vector.load %arg4[%c0_24, %c0_25] : memref<1x64xf32, #tpu.memory_space<vmem>>, vector<1x64xf32>
    %24 = vector.broadcast %23 : vector<1x64xf32> to vector<16x64xf32>
    %25 = arith.addf %22, %24 : vector<16x64xf32>
    %cst_26 = arith.constant 0.000000e+00 : f32
    %26 = vector.broadcast %cst_26 : f32 to vector<16x64xf32>
    %27 = arith.cmpf oge, %25, %26 : vector<16x64xf32>
    %28 = vector.broadcast %2 : f32 to vector<16x64xf32>
    %29 = arith.mulf %28, %25 : vector<16x64xf32>
    %30 = arith.select %27, %25, %29 : vector<16x64xi1>, vector<16x64xf32>
    %c0_27 = arith.constant 0 : index
    %c0_28 = arith.constant 0 : index
    %c0_29 = arith.constant 0 : index
    %31 = vector.load %arg2[%c0_27, %c0_28, %c0_29] : memref<3x16x16xf32, #tpu.memory_space<vmem>>, vector<1x16x16xf32>
    %32 = vector.shape_cast %31 : vector<1x16x16xf32> to vector<16x16xf32>
    %c0_30 = arith.constant 0 : index
    %c0_31 = arith.constant 0 : index
    %c0_32 = arith.constant 0 : index
    %33 = vector.load %arg6[%c0_30, %c0_31, %c0_32] : memref<3x64x64xf32, #tpu.memory_space<vmem>>, vector<1x64x64xf32>
    %34 = vector.shape_cast %33 : vector<1x64x64xf32> to vector<64x64xf32>
    %cst_33 = arith.constant dense<0.000000e+00> : vector<16x64xf32>
    %35 = tpu.matmul %30, %34, %cst_33 {dimension_numbers = #tpu.dot_dimension_numbers<[1], [0], [0], [1], [0, 0, 1, 1], [], []>} : vector<16x64xf32>, vector<64x64xf32>, vector<16x64xf32> -> vector<16x64xf32>
    %cst_34 = arith.constant dense<0.000000e+00> : vector<16x64xf32>
    %36 = tpu.matmul %32, %35, %cst_34 {dimension_numbers = #tpu.dot_dimension_numbers<[1], [0], [0], [1], [0, 0, 1, 1], [], []>} : vector<16x16xf32>, vector<16x64xf32>, vector<16x64xf32> -> vector<16x64xf32>
    %c1_35 = arith.constant 1 : index
    %c0_36 = arith.constant 0 : index
    %c0_37 = arith.constant 0 : index
    %37 = vector.load %arg2[%c1_35, %c0_36, %c0_37] : memref<3x16x16xf32, #tpu.memory_space<vmem>>, vector<1x16x16xf32>
    %38 = vector.shape_cast %37 : vector<1x16x16xf32> to vector<16x16xf32>
    %c1_38 = arith.constant 1 : index
    %c0_39 = arith.constant 0 : index
    %c0_40 = arith.constant 0 : index
    %39 = vector.load %arg6[%c1_38, %c0_39, %c0_40] : memref<3x64x64xf32, #tpu.memory_space<vmem>>, vector<1x64x64xf32>
    %40 = vector.shape_cast %39 : vector<1x64x64xf32> to vector<64x64xf32>
    %cst_41 = arith.constant dense<0.000000e+00> : vector<16x64xf32>
    %41 = tpu.matmul %30, %40, %cst_41 {dimension_numbers = #tpu.dot_dimension_numbers<[1], [0], [0], [1], [0, 0, 1, 1], [], []>} : vector<16x64xf32>, vector<64x64xf32>, vector<16x64xf32> -> vector<16x64xf32>
    %cst_42 = arith.constant dense<0.000000e+00> : vector<16x64xf32>
    %42 = tpu.matmul %38, %41, %cst_42 {dimension_numbers = #tpu.dot_dimension_numbers<[1], [0], [0], [1], [0, 0, 1, 1], [], []>} : vector<16x16xf32>, vector<16x64xf32>, vector<16x64xf32> -> vector<16x64xf32>
    %43 = arith.addf %36, %42 : vector<16x64xf32>
    %c2_43 = arith.constant 2 : index
    %c0_44 = arith.constant 0 : index
    %c0_45 = arith.constant 0 : index
    %44 = vector.load %arg2[%c2_43, %c0_44, %c0_45] : memref<3x16x16xf32, #tpu.memory_space<vmem>>, vector<1x16x16xf32>
    %45 = vector.shape_cast %44 : vector<1x16x16xf32> to vector<16x16xf32>
    %c2_46 = arith.constant 2 : index
    %c0_47 = arith.constant 0 : index
    %c0_48 = arith.constant 0 : index
    %46 = vector.load %arg6[%c2_46, %c0_47, %c0_48] : memref<3x64x64xf32, #tpu.memory_space<vmem>>, vector<1x64x64xf32>
    %47 = vector.shape_cast %46 : vector<1x64x64xf32> to vector<64x64xf32>
    %cst_49 = arith.constant dense<0.000000e+00> : vector<16x64xf32>
    %48 = tpu.matmul %30, %47, %cst_49 {dimension_numbers = #tpu.dot_dimension_numbers<[1], [0], [0], [1], [0, 0, 1, 1], [], []>} : vector<16x64xf32>, vector<64x64xf32>, vector<16x64xf32> -> vector<16x64xf32>
    %cst_50 = arith.constant dense<0.000000e+00> : vector<16x64xf32>
    %49 = tpu.matmul %45, %48, %cst_50 {dimension_numbers = #tpu.dot_dimension_numbers<[1], [0], [0], [1], [0, 0, 1, 1], [], []>} : vector<16x16xf32>, vector<16x64xf32>, vector<16x64xf32> -> vector<16x64xf32>
    %50 = arith.addf %43, %49 : vector<16x64xf32>
    %c0_51 = arith.constant 0 : index
    %c0_52 = arith.constant 0 : index
    %51 = vector.load %arg7[%c0_51, %c0_52] : memref<1x64xf32, #tpu.memory_space<vmem>>, vector<1x64xf32>
    %52 = vector.broadcast %51 : vector<1x64xf32> to vector<16x64xf32>
    %53 = arith.addf %50, %52 : vector<16x64xf32>
    %cst_53 = arith.constant 1.000000e-01 : f32
    %54 = vector.broadcast %cst_53 : f32 to vector<16x64xf32>
    %55 = arith.mulf %53, %54 : vector<16x64xf32>
    %56 = arith.addf %55, %1 : vector<16x64xf32>
    %c0_54 = arith.constant 0 : index
    %c0_55 = arith.constant 0 : index
    %c0_56 = arith.constant 0 : index
    %57 = vector.load %arg8[%c0_54, %c0_55, %c0_56] : memref<1x16x64xf32, #tpu.memory_space<vmem>>, vector<1x16x64xf32>
    %58 = vector.shape_cast %57 : vector<1x16x64xf32> to vector<16x64xf32>
    %59 = vector.shape_cast %56 : vector<16x64xf32> to vector<1x16x64xf32>
    tpu.vector_store %arg8[%c0_54, %c0_55, %c0_56], %59 {strides = array<i32>} : memref<1x16x64xf32, #tpu.memory_space<vmem>>, vector<1x16x64xf32>,
    return
  }
  func.func @transform_0(%arg0: i32) -> (i32, i32, i32) {
    %c0_i32 = arith.constant 0 : i32
    %c0_i32_0 = arith.constant 0 : i32
    %c0_i32_1 = arith.constant 0 : i32
    return %arg0, %c0_i32, %c0_i32_0 : i32, i32, i32
  }
  func.func @transform_1(%arg0: i32) -> (i32, i32, i32) {
    %c0_i32 = arith.constant 0 : i32
    %c0_i32_0 = arith.constant 0 : i32
    %c0_i32_1 = arith.constant 0 : i32
    %c0_i32_2 = arith.constant 0 : i32
    return %c0_i32, %c0_i32_0, %c0_i32_1 : i32, i32, i32
  }
  func.func @transform_2(%arg0: i32) -> (i32, i32, i32) {
    %c0_i32 = arith.constant 0 : i32
    %c0_i32_0 = arith.constant 0 : i32
    %c0_i32_1 = arith.constant 0 : i32
    %c0_i32_2 = arith.constant 0 : i32
    return %c0_i32, %c0_i32_0, %c0_i32_1 : i32, i32, i32
  }
  func.func @transform_3(%arg0: i32) -> (i32, i32) {
    %c0_i32 = arith.constant 0 : i32
    %c0_i32_0 = arith.constant 0 : i32
    %c0_i32_1 = arith.constant 0 : i32
    return %c0_i32, %c0_i32_0 : i32, i32
  }
  func.func @transform_4(%arg0: i32) -> i32 {
    %c0_i32 = arith.constant 0 : i32
    %c0_i32_0 = arith.constant 0 : i32
    return %c0_i32 : i32
  }
  func.func @transform_5(%arg0: i32) -> (i32, i32, i32) {
    %c0_i32 = arith.constant 0 : i32
    %c0_i32_0 = arith.constant 0 : i32
    %c0_i32_1 = arith.constant 0 : i32
    %c0_i32_2 = arith.constant 0 : i32
    return %c0_i32, %c0_i32_0, %c0_i32_1 : i32, i32, i32
  }
  func.func @transform_6(%arg0: i32) -> (i32, i32) {
    %c0_i32 = arith.constant 0 : i32
    %c0_i32_0 = arith.constant 0 : i32
    %c0_i32_1 = arith.constant 0 : i32
    return %c0_i32, %c0_i32_0 : i32, i32
  }
  func.func @transform_7(%arg0: i32) -> (i32, i32, i32) {
    %c0_i32 = arith.constant 0 : i32
    %c0_i32_0 = arith.constant 0 : i32
    %c0_i32_1 = arith.constant 0 : i32
    return %arg0, %c0_i32, %c0_i32_0 : i32, i32, i32
  }
}

</mosaic_0001>

<bundles_post_ra>
// kernel: tpu_custom_call.1
= control target key start
LH: loop header
LB: loop body
LE: loop exit
PB: predicated region body
PF: predicated region fallthrough
CT: control target
= control target key end

     0   :  { %s2574_s0 = inlined_call_operand.hbm [shape: f32[2,16,64], index: 0, kind: input, shape index: {}]   ;;  %s2575_s1 = inlined_call_operand.hbm [shape: f32[3,16,16], index: 1, kind: input, shape index: {}]   ;;  %s2576_s2 = inlined_call_operand.hbm [shape: f32[3,64,64], index: 2, kind: input, shape index: {}]   ;;  %s2577_s3 = inlined_call_operand.vmem [shape: f32[1,64], index: 3, kind: input, shape index: {}]   ;;  %s2578_s4 = inlined_call_operand.<no memory space> [shape: f32[1], index: 4, kind: input, shape index: {}]   ;;  %s2579_s5 = inlined_call_operand.hbm [shape: f32[3,64,64], index: 5, kind: input, shape index: {}]   ;;  %s2580_s6 = inlined_call_operand.vmem [shape: f32[1,64], index: 6, kind: input, shape index: {}]   ;;  %s2581_s7 = inlined_call_operand.hbm [shape: f32[2,16,64], index: 7, kind: output, shape index: {}]  }
   0x1   :  { %12 = sst [smem:[#allocation2]] %s2578_s4 }
   0x2   :  { %13 = vsyncpa [#allocation4], 0 }
   0x3   :  { %15 = vsyncpa [#allocation4 + $0x1], 0 }
   0x4   :  { %16 = vsyncpa [#allocation7], 0 }
   0x5   :  { %17 = vsyncpa [#allocation10], 0 }
   0x6   :  { %18 = vsyncpa [#allocation5], 0 }
   0x7   :  { %20 = vsyncpa [#allocation5 + $0x1], 0  ;;  %s2227_s26 = smov 0   ;;  %s2229_s27 = smov 0  }
   0x8   :  { %s2231_s28 = smov 0   ;;  %s2233_s29 = smov 0  }
   0x9 LB: > { %s2248_s4 = sadd.s32 4294967295, %s2173_s29   ;;  %s1488_s30 = sadd.s32 4294967294, %s2173_s29   ;;  %s2173_s29 = sphi %s2233_s29, %s2604_s29   ;;  %s2169_s28 = sphi %s2231_s28, %s2603_s28   ;;  %s2165_s27 = sphi %s2229_s27, %s2602_s27   ;;  %s2161_s26 = sphi %s2227_s26, %s2601_s26  }
   0xa   : > { %p46_p0 = scmp.ne.s32.totalorder %s2165_s27, %s2161_s26  ;;  %p2582_p1 = scmp.eq.s32.totalorder %s2248_s4, 0 }
   0xb   : > { %p202_p3 = scmp.eq.s32.totalorder %s1488_s30, 1  ;;  %p1489_p5 = scmp.ge.s32.totalorder %s2173_s29, 1 }
   0xc   : > { %p2257_p4 = por %p2582_p1, %p46_p0  ;;  %p209_p7 = scmp.lt.s32.totalorder %s2173_s29, 3 }
   0xd   : > { %p2262_p6 = por %p202_p3, %p46_p0  ;;  %s2175_s11 = smov [#allocation6]  }
   0xe   : > { %s2585_s8 = scalar_select %p2257_p4, 1, 0 }
   0xf   : > { %s2586_s9 = scalar_select %p2262_p6, 1, 0 }
  0x10   : > { %p2267_p8 = pnand %p1489_p5, %p209_p7  ;;  %s221_s12 = sshll.u32 %s2175_s11, 4  ;;  %s2271_s12 = int_to_ptr.vmem [resolvable:$true] %s221_s12 }
  0x11   : > { %s2176_s14 = smov [#allocation8]   ;;  %s2177_s16 = smov [#allocation9]  }
  0x12   : > { %s2587_s10 = scalar_select %p2267_p8, 1, 0 }
  0x13   : > { %p1920_p9 = pneg %p2267_p8  ;;  %s234_s15 = sshll.u32 %s2176_s14, 4  ;;  %s2282_s15 = int_to_ptr.vmem [resolvable:$true] %s234_s15 }
  0x14   : > { %s2284_s17 = sshll.u32 %s2177_s16, 4  ;;  %s1985_s20 = scalar_lea.hbm %s2575_s1, 768  ;;  %s254_s17 = int_to_ptr.vmem [resolvable:$true] %s2284_s17 }
  0x15   : > { %p2278_p11 = pnand %p1920_p9, %p2582_p1  ;;  %p1986_p12 = scmp.ne.s32.totalorder %s2575_s1, %s1985_s20 }
  0x16   : > { %p1992_p5 = scmp.lt.u32.totalorder %s1985_s20, %s2575_s1 }
  0x17   : > { %p2294_p13 = pneg %p2278_p11 }
  0x19   : > { %p1988_p0 = pnand %p2294_p13, %p1986_p12 }
  0x1b   : > { %p1989_p3 = pneg %p1988_p0 }
  0x1d   : > { %p1994_p7 = pnand %p1992_p5, %p1989_p3 }
  0x1f   : > { %1997 = shalt.err (!%p1994_p7)
}
  0x20   : > { %s1998_s30 = scalar_lea.vmem %s2271_s12, 768  ;;  %p2006_p2 = scmp.lt.s32.totalorder %s2271_s12, %s2271_s12 }
  0x21   : > { %p1999_p9 = scmp.ne.s32.totalorder %s2271_s12, %s1998_s30  ;;  %p2007_p6 = scmp.lt.s32.totalorder %s1998_s30, %s1998_s30 }
  0x23   : > { %p2001_p10 = pnand %p1999_p9, %p2294_p13  ;;  %p2008_p12 = por %p2007_p6, %p2006_p2 }
  0x25   : > { %p2002_p1 = pneg %p2001_p10 }
  0x27   : > { %p2009_p0 = pnand %p2008_p12, %p2002_p1 }
  0x29   : > { %2012 = shalt.err (!%p2009_p0)
}
  0x2a   : > { %s2178_s11 = smov 128   ;;  %s2179_s14 = smov 8  }
  0x2b   : > { %1923 = dma.hbm_to_vmem [thread:$0]  (!%p2278_p11), %s2575_s1, 768, %s2271_s12, [#allocation7], %s2178_s11, %s2178_s11, %s2179_s14  }
  0x2c   : > { %s2013_s21 = scalar_lea.hbm %s2576_s2, 3072 }
  0x2d   : > { %p2014_p1 = scmp.ne.s32.totalorder %s2576_s2, %s2013_s21  ;;  %p2020_p10 = scmp.lt.u32.totalorder %s2013_s21, %s2576_s2 }
  0x2f   : > { %p2016_p2 = pnand %p2014_p1, %p2294_p13 }
  0x31   : > { %p2017_p6 = pneg %p2016_p2 }
  0x33   : > { %p2022_p3 = pnand %p2020_p10, %p2017_p6 }
  0x35   : > { %2025 = shalt.err (!%p2022_p3)
}
  0x36   : > { %s2026_s12 = scalar_lea.vmem %s2282_s15, 3072  ;;  %p2034_p12 = scmp.lt.s32.totalorder %s2282_s15, %s2282_s15 }
  0x37   : > { %p2027_p5 = scmp.ne.s32.totalorder %s2282_s15, %s2026_s12  ;;  %p2035_p0 = scmp.lt.s32.totalorder %s2026_s12, %s2026_s12 }
  0x39   : > { %p2029_p7 = pnand %p2027_p5, %p2294_p13  ;;  %p2036_p1 = por %p2035_p0, %p2034_p12 }
  0x3b   : > { %p2030_p9 = pneg %p2029_p7 }
  0x3d   : > { %p2037_p2 = pnand %p2036_p1, %p2030_p9 }
  0x3f   : > { %2040 = shalt.err (!%p2037_p2)
}
  0x40   : > { %1926 = dma.hbm_to_vmem [thread:$0]  (!%p2278_p11), %s2576_s2, 3072, %s2282_s15, [#allocation7], %s2178_s11, %s2178_s11, %s2179_s14  }
  0x41   : > { %s2041_s21 = scalar_lea.hbm %s2579_s5, 3072 }
  0x42   : > { %p2042_p6 = scmp.ne.s32.totalorder %s2579_s5, %s2041_s21  ;;  %p2048_p5 = scmp.lt.u32.totalorder %s2041_s21, %s2579_s5 }
  0x44   : > { %p2044_p10 = pnand %p2042_p6, %p2294_p13 }
  0x46   : > { %p2045_p3 = pneg %p2044_p10 }
  0x48   : > { %p2050_p7 = pnand %p2048_p5, %p2045_p3 }
  0x4a   : > { %2053 = shalt.err (!%p2050_p7)
}
  0x4b   : > { %s2054_s12 = scalar_lea.vmem %s254_s17, 3072  ;;  %p2062_p1 = scmp.lt.s32.totalorder %s254_s17, %s254_s17 }
  0x4c   : > { %p2055_p9 = scmp.ne.s32.totalorder %s254_s17, %s2054_s12  ;;  %p2063_p2 = scmp.lt.s32.totalorder %s2054_s12, %s2054_s12 }
  0x4e   : > { %p2057_p12 = pnand %p2055_p9, %p2294_p13  ;;  %p2064_p4 = por %p2063_p2, %p2062_p1 }
  0x50   : > { %p2058_p0 = pneg %p2057_p12 }
  0x52   : > { %p2065_p8 = pnand %p2064_p4, %p2058_p0 }
  0x54   : > { %2068 = shalt.err (!%p2065_p8)
}
  0x55   : > { %1929 = dma.hbm_to_vmem [thread:$0]  (!%p2278_p11), %s2579_s5, 3072, %s254_s17, [#allocation10], %s2178_s11, %s2178_s11, %s2179_s14  }
  0x56   : > { %s2367_s23 = sadd.s32 1, %s2173_s29   ;;  %s33_s18 = sadd.s32 1, %s2169_s28 }
  0x57   : > { %s30_s13 = ssub.s32 %s2173_s29, %s2367_s23  ;;  %p40_p8 = scmp.ne.s32.totalorder %s2169_s28, %s2165_s27 }
  0x58   : > { %p31_p4 = scmp.eq.s32.totalorder %s30_s13, 0  ;;  %p41_p13 = scmp.eq.s32.totalorder %s2173_s29, 0 }
  0x59   : > { %p1941_p6 = scmp.lt.s32.totalorder %s2173_s29, 2  ;;  %p2590_p3 = scmp.eq.s32.totalorder %s2248_s4, 1 }
  0x5a   : > { %s2377_s19 = scalar_select %p31_p4, %s2169_s28, %s33_s18  }
  0x5b   : > { %p42_p10 = por %p41_p13, %p40_p8  ;;  %p2381_p5 = por %p2590_p3, %p40_p8 }
  0x5c   : > { %s270_s21 = sand.u32 1, %s2169_s28   ;;  %s1534_s22 = sshll.u32 %s2173_s29, 8 }
  0x5d   : > { %s1494_s17 = sshll.u32 %s270_s21, 4  ;;  %s2390_s30 = scalar_lea.hbm %s2574_s0, %s1534_s22 }
  0x5e   : > { %s274_s12 = scalar_lea.vmem [#allocation3], %s1494_s17  ;;  %p2392_p11 = pnand %p1941_p6, %p42_p10 }
  0x5f   : > { %s281_s15 = sshll.u32 %s274_s12, 4  ;;  %s2398_s13 = scalar_lea.sflag [#allocation4], %s270_s21  ;;  %s2396_s15 = int_to_ptr.vmem [resolvable:$true] %s281_s15 }
  0x60   : > { %s2069_s18 = scalar_lea.hbm %s2390_s30, 256  ;;  %p2071_p9 = pneg %p2392_p11 }
  0x61   : > { %p2070_p7 = scmp.ne.s32.totalorder %s2390_s30, %s2069_s18  ;;  %s2074_s24 = scalar_lea.hbm %s2574_s0, 512 }
  0x62   : > { %p2075_p1 = scmp.lt.u32.totalorder %s2390_s30, %s2574_s0  ;;  %p2076_p2 = scmp.lt.u32.totalorder %s2074_s24, %s2069_s18 }
  0x63   : > { %p2072_p12 = pnand %p2071_p9, %p2070_p7  ;;  %p2078_p8 = scmp.lt.u32.totalorder %s2069_s18, %s2390_s30 }
  0x64   : > { %p2077_p4 = por %p2076_p2, %p2075_p1 }
  0x65   : > { %p2073_p0 = pneg %p2072_p12 }
  0x66   : > { %p2079_p13 = por %p2078_p8, %p2077_p4 }
  0x68   : > { %p2080_p6 = pnand %p2079_p13, %p2073_p0 }
  0x6a   : > { %2083 = shalt.err (!%p2080_p6)
}
  0x6b   : > { %s2084_s21 = scalar_lea.vmem %s2396_s15, 256  ;;  %s2180_s22 = smov [#allocation3]  }
  0x6c   : > { %p2085_p10 = scmp.ne.s32.totalorder %s2396_s15, %s2084_s21  ;;  %s2089_s17 = sshll.u32 %s2180_s22, 4  ;;  %s2090_s17 = int_to_ptr.vmem [resolvable:$false] %s2089_s17 }
  0x6d   : > { %s2091_s25 = scalar_lea.vmem %s2090_s17, 512  ;;  %p2092_p12 = scmp.lt.s32.totalorder %s2396_s15, %s2090_s17 }
  0x6e   : > { %p2087_p3 = pnand %p2085_p10, %p2071_p9  ;;  %p2093_p1 = scmp.lt.s32.totalorder %s2091_s25, %s2084_s21 }
  0x70   : > { %p2088_p7 = pneg %p2087_p3  ;;  %p2094_p2 = por %p2093_p1, %p2092_p12 }
  0x72   : > { %p2095_p4 = pnand %p2094_p2, %p2088_p7 }
  0x74   : > { %2098 = shalt.err (!%p2095_p4)
}
  0x75   : > { %1933 = dma.hbm_to_vmem [thread:$0]  (!%p2392_p11), %s2390_s30, 256, %s2396_s15, %s2398_s13, %s2178_s11, %s2178_s11, %s2179_s14  }
  0x76   : > { %p2593_p9 = scmp.ne.s32.totalorder %s2587_s10, 0 }
  0x77   : > { %s2432_s18 = sand.u32 (!%p2593_p9), 1, %s2165_s27   ;;  %p2594_p0 = scmp.ne.s32.totalorder (!%p2593_p9), %s2585_s8, 0 }
  0x78   : > { %293 = sbr.rel (%p2593_p9) target bundleno = 1077 (0x435), region = 48  ;;  %s1498_s24 = sshll.u32 (!%p2593_p9), %s2432_s18, 4 }
  0x79   : > { %s296_s12 = scalar_lea.sflag (!%p2593_p9), [#allocation4], %s2432_s18  ;;  %s2438_s16 = scalar_lea.vmem (!%p2593_p9), [#allocation3], %s1498_s24 }
  0x7f   : > { %2144 = dma.done.wait (%p2594_p0), %s296_s12, 256  }
  0x80   : > { %2146 = vsyncadd (%p2594_p0), %s296_s12, 4294967040  ;;  %p2595_p11 = scmp.eq.s32.totalorder %s2248_s4, 0 }
  0x82   : > { %2148 = dma.done.wait (%p2595_p11), [#allocation7], 3840   ;;  %p2596_p8 = pmov %p2595_p11 }
  0x84   : > { %2150 = vsyncadd (%p2596_p8), [#allocation7], 4294963456  ;;  %p2597_p13 = pmov %p2596_p8 }
  0x85   : > { %p2598_p6 = pmov %p2596_p8 }
  0x86   : > { %2152 = dma.done.wait (%p2597_p13), [#allocation10], 3072  }
  0x87   : > { %2154 = vsyncadd (%p2598_p6), [#allocation10], 4294964224  ;;  %v441_v0 = vld [vmem:[#allocation8 + $0x40] sm:$0xff]  ;;  %v442_v1 = vld [vmem:[#allocation8 + $0x48] sm:$0xff]  ;;  %vm355_vm0 = vcmask 523264   ;;  %vm524_vm1 = vcmask 130048  }
  0x88   : > { %v443_v2 = vld [vmem:[#allocation8 + $0x50] sm:$0xff]  ;;  %v1792_v3 = vpack.c.bf16 %v442_v1, %v441_v0  ;;  %v444_v4 = vld [vmem:[#allocation8 + $0x58] sm:$0xff]  ;;  %v347_v5 = vld [vmem:[#allocation8] sm:$0xff]  ;;  %s344_s8 = sld [smem:[#allocation2]]  ;;  %s1535_s15 = sshll.u32 %s2248_s4, 8 }
  0x89   : > { %v348_v6 = vld [vmem:[#allocation8 + $0x8] sm:$0xff]  ;;  %v1796_v7 = vpack.c.bf16 %v444_v4, %v443_v2  ;;  %v445_v9 = vld [vmem:[#allocation8 + $0x60] sm:$0xff]  ;;  %v349_v11 = vld [vmem:[#allocation8 + $0x10] sm:$0xff]  ;;  %s341_s13 = scalar_lea.vmem [#allocation11], %s1498_s24  ;;  %s2525_s25 = scalar_lea.hbm %s2581_s7, %s1535_s15 }
  0x8a   : > { %v1776_v8 = vpack.c.bf16 %v348_v6, %v347_v5  ;;  %v446_v10 = vld [vmem:[#allocation8 + $0x68] sm:$0xff]  ;;  %1793 = vmatprep.subr.bf16.mxu1 %v1792_v3  ;;  %v350_v12 = vld [vmem:[#allocation8 + $0x18] sm:$0xff]  ;;  %v351_v14 = vld [vmem:[#allocation8 + $0x20] sm:$0xff]  ;;  %s1386_s21 = sshll.u32 %s341_s13, 4  ;;  %s1373_s4 = scalar_lea.sflag [#allocation5], %s2432_s18  ;;  %s2527_s21 = int_to_ptr.vmem [resolvable:$true] %s1386_s21 }
  0x8b   : > { %1795 = vmatpush3.bf16.msra.mxu1 %v1792_v3  ;;  %v1780_v13 = vpack.c.bf16 %v350_v12, %v349_v11  ;;  %v352_v15 = vld [vmem:[#allocation8 + $0x28] sm:$0xff]  ;;  %v2453_v16 = vld [vmem:[%s2438_s16] sm:$0xff]  ;;  %v1800_v17 = vpack.c.bf16 %v446_v10, %v445_v9  ;;  %v448_v19 = vld [vmem:[#allocation8 + $0x78] sm:$0xff]  ;;  %s2099_s24 = scalar_lea.vmem %s2527_s21, 256  ;;  %s2181_s12 = smov [#allocation11]  }
  0x8c   : > { %1777 = vmatprep.subr.bf16.mxu0 %v1776_v8  ;;  %1797 = vmatprep.subr.bf16.mxu1 %v1796_v7  ;;  %v447_v18 = vld [vmem:[#allocation8 + $0x70] sm:$0xff]  ;;  %v1784_v20 = vpack.c.bf16 %v352_v15, %v351_v14  ;;  %v354_v22 = vld [vmem:[#allocation8 + $0x38] sm:$0xff]  ;;  %v691_v24 = vld [vmem:[#allocation8 + $0x80] sm:$0xff]  ;;  %p2100_p10 = scmp.ne.s32.totalorder %s2527_s21, %s2099_s24 }
  0x8d   : > { %1779 = vmatpush3.bf16.msra.mxu0 %v1776_v8  ;;  %1655 = vmatprep.mubr.msk.f32.mxu1 %vm355_vm0, %v2453_v16  ;;  %v353_v21 = vld [vmem:[#allocation8 + $0x30] sm:$0xff]  ;;  %v1804_v23 = vpack.c.bf16 %v448_v19, %v447_v18  ;;  %v692_v25 = vld [vmem:[#allocation8 + $0x88] sm:$0xff]  ;;  %v694_v29 = vld [vmem:[#allocation8 + $0x98] sm:$0xff] }
  0x8e   : > { %1781 = vmatprep.subr.bf16.mxu0 %v1780_v13  ;;  %1636 = vmatprep.mubr.msk.f32.mxu0 %vm355_vm0, %v2453_v16  ;;  %v1788_v26 = vpack.c.bf16 %v354_v22, %v353_v21  ;;  %v1816_v27 = vpack.c.bf16 %v692_v25, %v691_v24  ;;  %v693_v28 = vld [vmem:[#allocation8 + $0x90] sm:$0xff]  ;;  %v2460_v30 = vld [vmem:[%s2438_s16 + $0x8] sm:$0xff]  ;;  %v695_v32 = vld [vmem:[#allocation8 + $0xa0] sm:$0xff]  ;;  %v868_v19 = vstv %s344_s8  ;;  %p2101_p3 = pnand %p2100_p10, %p2381_p5  ;;  %s2103_s16 = sshll.u32 %s2181_s12, 4  ;;  %s2104_s16 = int_to_ptr.vmem [resolvable:$false] %s2103_s16 }
  0x8f   : > { %1799 = vmatpush3.bf16.msra.mxu1 %v1796_v7  ;;  %v1820_v31 = vpack.c.bf16 %v694_v29, %v693_v28  ;;  %v696_v33 = vld [vmem:[#allocation8 + $0xa8] sm:$0xff]  ;;  %v697_v35 = vld [vmem:[#allocation8 + $0xb0] sm:$0xff]  ;;  %v698_v36 = vld [vmem:[#allocation8 + $0xb8] sm:$0xff]  ;;  %s2105_s8 = scalar_lea.vmem %s2104_s16, 512  ;;  %p2106_p12 = scmp.lt.s32.totalorder %s2527_s21, %s2104_s16 }
  0x90   : > { %1801 = vmatprep.subr.bf16.mxu1 %v1800_v17  ;;  %v1824_v34 = vpack.c.bf16 %v696_v33, %v695_v32  ;;  %v1828_v37 = vpack.c.bf16 %v698_v36, %v697_v35  ;;  %v2470_v38 = vld [vmem:[#allocation6 + $0x10] sm:$0xff]  ;;  %v964_v40 = vld [vmem:[#allocation9 + $0x48] sm:$0xff]  ;;  %v965_v42 = vld [vmem:[#allocation9 + $0x50] sm:$0xff]  ;;  %p2102_p7 = pneg %p2101_p3  ;;  %p2107_p1 = scmp.lt.s32.totalorder %s2105_s8, %s2099_s24 }
  0x91   : > { %1783 = vmatpush3.bf16.msra.mxu0 %v1780_v13  ;;  %v963_v39 = vld [vmem:[#allocation9 + $0x40] sm:$0xff]  ;;  %v966_v43 = vld [vmem:[#allocation9 + $0x58] sm:$0xff]  ;;  %v968_v46 = vld [vmem:[#allocation9 + $0x68] sm:$0xff] }
  0x92   : > { %1785 = vmatprep.subr.bf16.mxu0 %v1784_v20  ;;  %v1852_v41 = vpack.c.bf16 %v964_v40, %v963_v39  ;;  %v1856_v44 = vpack.c.bf16 %v966_v43, %v965_v42  ;;  %v967_v45 = vld [vmem:[#allocation9 + $0x60] sm:$0xff]  ;;  %v2474_v54 = vld [vmem:[#allocation6 + $0x18] sm:$0xff]  ;;  %v2476_v55 = vld [vmem:[#allocation6] sm:$0xff]  ;;  %p2108_p2 = por %p2107_p1, %p2106_p12 }
  0x93   : > { %1803 = vmatpush3.bf16.msra.mxu1 %v1800_v17  ;;  %v1860_v47 = vpack.c.bf16 %v968_v46, %v967_v45  ;;  %v2482_v56 = vld [vmem:[#allocation6 + $0x8] sm:$0xff]  ;;  %v2484_v57 = vld [vmem:[#allocation6 + $0x20] sm:$0xff]  ;;  %v873_v58 = vld [vmem:[#allocation9] sm:$0xff] }
  0x94   : > { %1805 = vmatprep.subr.bf16.mxu1 %v1804_v23  ;;  %v874_v59 = vld [vmem:[#allocation9 + $0x8] sm:$0xff]  ;;  %v875_v0 = vld [vmem:[#allocation9 + $0x10] sm:$0xff]  ;;  %v876_v1 = vld [vmem:[#allocation9 + $0x18] sm:$0xff]  ;;  %p2109_p4 = pnand %p2108_p2, %p2102_p7 }
  0x95   : > { %1787 = vmatpush3.bf16.msra.mxu0 %v1784_v20  ;;  %v1836_v63 = vpack.c.bf16 %v874_v59, %v873_v58  ;;  %v2490_v2 = vld [vmem:[#allocation6 + $0x28] sm:$0xff]  ;;  %v1840_v3 = vpack.c.bf16 %v876_v1, %v875_v0  ;;  %v877_v4 = vld [vmem:[#allocation9 + $0x20] sm:$0xff]  ;;  %v878_v5 = vld [vmem:[#allocation9 + $0x28] sm:$0xff] }
  0x96   : > { %1789 = vmatprep.subr.bf16.mxu0 %v1788_v26  ;;  %v1844_v6 = vpack.c.bf16 %v878_v5, %v877_v4  ;;  %v969_v7 = vld [vmem:[#allocation9 + $0x70] sm:$0xff]  ;;  %v970_v8 = vld [vmem:[#allocation9 + $0x78] sm:$0xff]  ;;  %v1197_v13 = vld [vmem:[#allocation9 + $0x80] sm:$0xff] }
  0x97   : > { %1807 = vmatpush3.bf16.msra.mxu1 %v1804_v23  ;;  %v1864_v9 = vpack.c.bf16 %v970_v8, %v969_v7  ;;  %v879_v10 = vld [vmem:[#allocation9 + $0x30] sm:$0xff]  ;;  %v880_v11 = vld [vmem:[#allocation9 + $0x38] sm:$0xff]  ;;  %v1198_v14 = vld [vmem:[#allocation9 + $0x88] sm:$0xff] }
  0x98   : > { %1817 = vmatprep.subr.bf16.mxu1 %v1816_v27  ;;  %v1848_v12 = vpack.c.bf16 %v880_v11, %v879_v10  ;;  %v1876_v15 = vpack.c.bf16 %v1198_v14, %v1197_v13  ;;  %v1515_v17 = vld [vmem:[%s2577_s3] ss:$0 sm:$0xff]  ;;  %v1200_v25 = vld [vmem:[#allocation9 + $0x98] sm:$0xff]  ;;  %v1202_v32 = vld [vmem:[#allocation9 + $0xa8] sm:$0xff] }
  0x99   : > { %1791 = vmatpush3.bf16.msra.mxu0 %v1788_v26  ;;  %v1199_v24 = vld [vmem:[#allocation9 + $0x90] sm:$0xff]  ;;  %v1204_v35 = vld [vmem:[#allocation9 + $0xb8] sm:$0xff] }
  0x9a   : > { %1656 = vmatmul.mubr.msk.f32.vlgmr.msra.gmra.mrb[0].mxu1 %vm355_vm0, %v2460_v30  ;;  %v1880_v28 = vpack.c.bf16 %v1200_v25, %v1199_v24  ;;  %v1528_v46 = vld [vmem:[%s2580_s6] ss:$0 sm:$0xff] }
  0x9b   : > { %1819 = vmatpush3.bf16.msra.mxu1 %v1816_v27  ;;  %1688 = vmatprep.mubr.msk.f32.mxu1 %vm355_vm0, %v2453_v16 }
  0x9c   : > { %1637 = vmatmul.mubr.msk.f32.vlgmr.msra.gmra.mrb[0].mxu0 %vm355_vm0, %v2460_v30  ;;  %1821 = vmatprep.subr.bf16.mxu1 %v1820_v31 }
  0x9d   : > { %1662 = vmatprep.mubr.msk.f32.mxu0 %vm524_vm1, %v2470_v38 }
  0x9f   : > { %1823 = vmatpush3.bf16.msra.mxu1 %v1820_v31  ;;  %v1201_v31 = vld [vmem:[#allocation9 + $0xa0] sm:$0xff] }
  0xa0   : > { %1825 = vmatprep.subr.bf16.mxu1 %v1824_v34  ;;  %v1884_v33 = vpack.c.bf16 %v1202_v32, %v1201_v31 }
  0xa3   : > { %1827 = vmatpush3.bf16.msra.mxu1 %v1824_v34  ;;  %v1203_v34 = vld [vmem:[#allocation9 + $0xb0] sm:$0xff] }
  0xa4   : > { %1829 = vmatprep.subr.bf16.mxu1 %v1828_v37  ;;  %v1888_v36 = vpack.c.bf16 %v1204_v35, %v1203_v34 }
  0xa7   : > { %1831 = vmatpush3.bf16.msra.mxu1 %v1828_v37 }
  0xa8   : > { %1853 = vmatprep.subr.bf16.mxu1 %v1852_v41 }
  0xaa   : > { %1689 = vmatmul.mubr.msk.f32.vlgmr.msra.gmra.mrb[2].mxu1 %vm355_vm0, %v2460_v30 }
  0xab   : > { %1855 = vmatpush3.bf16.msra.mxu1 %v1852_v41 }
  0xac   : > { %1857 = vmatprep.subr.bf16.mxu1 %v1856_v44 }
  0xaf   : > { %1859 = vmatpush3.bf16.msra.mxu1 %v1856_v44 }
  0xb0   : > { %1861 = vmatprep.subr.bf16.mxu1 %v1860_v47 }
  0xb3   : > { %1863 = vmatpush3.bf16.msra.mxu1 %v1860_v47 }
  0xb4   : > { %1865 = vmatprep.subr.bf16.mxu1 %v1864_v9 }
  0xb7   : > { %1867 = vmatpush3.bf16.msra.mxu1 %v1864_v9 }
  0xb8   : > { %1877 = vmatprep.subr.bf16.mxu1 %v1876_v15 }
 0x16d   : > { %v1657_v48 = vpop.f32.mrb[0].mxu1 }
 0x16e   : > { %v515_v49 = vpop.f32.mrb[1].mxu1 }
 0x16f   : > { %v1638_v50 = vpop.f32.mrb[0].mxu0  ;;  %v1808_v51 = vpack.c.bf16 %v1657_v48, %v515_v49 }
 0x170   : > { %v428_v52 = vpop.f32.mrb[1].mxu0 }
 0x171   : > { %v1812_v53 = vpack.c.bf16 %v1638_v50, %v428_v52  ;;  %1809 = vmatprep.subr.bf16.mxu0 %v1808_v51 }
 0x172   : > { %1811 = vmatpush3.bf16.msra.mxu0 %v1808_v51 }
 0x173   : > { %1813 = vmatprep.subr.bf16.mxu0 %v1812_v53 }
 0x175   : > { %1663 = vmatmul.mubr.msk.f32.vlgmr.msra.gmra.mrb[2].mxu0 %vm524_vm1, %v2474_v54 }
 0x176   : > { %1815 = vmatpush3.bf16.msra.mxu0 %v1812_v53  ;;  %1669 = vmatprep.mubr.msk.f32.mxu0 %vm524_vm1, %v2476_v55 }
 0x17d   : > { %1670 = vmatmul.mubr.msk.f32.vlgmr.msra.gmra.mrb[2].mxu0 %vm524_vm1, %v2482_v56  ;;  %v1690_v60 = vpop.f32.mrb[2].mxu1 }
 0x17e   : > { %v765_v61 = vpop.f32.mrb[3].mxu1  ;;  %1695 = vmatprep.mubr.msk.f32.mxu0 %vm524_vm1, %v2484_v57 }
 0x17f   : > { %v1832_v62 = vpack.c.bf16 %v1690_v60, %v765_v61 }
 0x181   : > { %1833 = vmatprep.subr.bf16.mxu0 %v1832_v62 }
 0x182   : > { %1835 = vmatpush3.bf16.msra.mxu0 %v1832_v62 }
 0x183   : > { %1837 = vmatprep.subr.bf16.mxu0 %v1836_v63 }
 0x185   : > { %1696 = vmatmul.mubr.msk.f32.vlgmr.msra.gmra.mrb[2].mxu0 %vm524_vm1, %v2490_v2 }
 0x186   : > { %1839 = vmatpush3.bf16.msra.mxu0 %v1836_v63 }
 0x187   : > { %1841 = vmatprep.subr.bf16.mxu0 %v1840_v3 }
 0x18a   : > { %1843 = vmatpush3.bf16.msra.mxu0 %v1840_v3 }
 0x18b   : > { %1845 = vmatprep.subr.bf16.mxu0 %v1844_v6 }
 0x18e   : > { %1847 = vmatpush3.bf16.msra.mxu0 %v1844_v6 }
 0x18f   : > { %1849 = vmatprep.subr.bf16.mxu0 %v1848_v12 }
 0x192   : > { %1851 = vmatpush3.bf16.msra.mxu0 %v1848_v12 }
 0x258   : > { %v1697_v18 = vpop.f32.mrb[2].mxu0 }
 0x259   : > { %v865_v20 = vadd.f32 %v1697_v18, %v1515_v17  ;;  %v846_v21 = vpop.f32.mrb[3].mxu0 }
 0x25a   : > { %v864_v22 = vadd.f32 %v1515_v17, %v846_v21 }
 0x25b   : > { %v870_v23 = vmul.f32 %v868_v19, %v865_v20  ;;  %vm867_vm2 = vcmp.ge.f32.partialorder %v865_v20, 0.0 }
 0x25c   : > { %vm866_vm3 = vcmp.ge.f32.partialorder %v864_v22, 0.0  ;;  %v869_v26 = vmul.f32 %v868_v19, %v864_v22 }
 0x25d   : > { %v872_v29 = vsel %vm867_vm2, %v865_v20, %v870_v23 }
 0x25e   : > { %v871_v27 = vsel %vm866_vm3, %v864_v22, %v869_v26 }
 0x25f   : > { %1714 = vmatprep.mubr.msk.f32.mxu0 %vm355_vm0, %v871_v27  ;;  %1733 = vmatprep.mubr.msk.f32.mxu1 %vm355_vm0, %v871_v27 }
 0x260   : > { %1715 = vmatmul.mubr.msk.f32.vlgmr.msra.gmra.mrb[4].mxu0 %vm355_vm0, %v872_v29  ;;  %1734 = vmatmul.mubr.msk.f32.vlgmr.msra.gmra.mrb[4].mxu1 %vm355_vm0, %v872_v29 }
 0x261   : > { %1879 = vmatpush3.bf16.msra.mxu1 %v1876_v15  ;;  %1766 = vmatprep.mubr.msk.f32.mxu1 %vm355_vm0, %v871_v27 }
 0x262   : > { %1881 = vmatprep.subr.bf16.mxu1 %v1880_v28  ;;  %1740 = vmatprep.mubr.msk.f32.mxu0 %vm524_vm1, %v2470_v38 }
 0x265   : > { %1883 = vmatpush3.bf16.msra.mxu1 %v1880_v28 }
 0x266   : > { %1885 = vmatprep.subr.bf16.mxu1 %v1884_v33 }
 0x269   : > { %1887 = vmatpush3.bf16.msra.mxu1 %v1884_v33 }
 0x26a   : > { %1889 = vmatprep.subr.bf16.mxu1 %v1888_v36 }
 0x26d   : > { %1891 = vmatpush3.bf16.msra.mxu1 %v1888_v36 }
 0x270   : > { %1767 = vmatmul.mubr.msk.f32.vlgmr.msra.gmra.mrb[6].mxu1 %vm355_vm0, %v872_v29 }
 0x333   : > { %v1716_v37 = vpop.f32.mrb[4].mxu0  ;;  %v1735_v39 = vpop.f32.mrb[4].mxu1 }
 0x334   : > { %v953_v40 = vpop.f32.mrb[5].mxu0  ;;  %v1037_v41 = vpop.f32.mrb[5].mxu1 }
 0x335   : > { %v1872_v42 = vpack.c.bf16 %v1716_v37, %v953_v40  ;;  %v1868_v43 = vpack.c.bf16 %v1735_v39, %v1037_v41 }
 0x337   : > { %1869 = vmatprep.subr.bf16.mxu0 %v1868_v43 }
 0x338   : > { %1871 = vmatpush3.bf16.msra.mxu0 %v1868_v43 }
 0x339   : > { %1873 = vmatprep.subr.bf16.mxu0 %v1872_v42 }
 0x33b   : > { %1741 = vmatmul.mubr.msk.f32.vlgmr.msra.gmra.mrb[6].mxu0 %vm524_vm1, %v2474_v54 }
 0x33c   : > { %1875 = vmatpush3.bf16.msra.mxu0 %v1872_v42  ;;  %1747 = vmatprep.mubr.msk.f32.mxu0 %vm524_vm1, %v2476_v55 }
 0x343   : > { %v1768_v38 = vpop.f32.mrb[6].mxu1  ;;  %1748 = vmatmul.mubr.msk.f32.vlgmr.msra.gmra.mrb[6].mxu0 %vm524_vm1, %v2482_v56 }
 0x344   : > { %v1271_v44 = vpop.f32.mrb[7].mxu1  ;;  %1773 = vmatprep.mubr.msk.f32.mxu0 %vm524_vm1, %v2484_v57 }
 0x345   : > { %v1892_v45 = vpack.c.bf16 %v1768_v38, %v1271_v44 }
 0x347   : > { %1893 = vmatprep.subr.bf16.mxu0 %v1892_v45 }
 0x348   : > { %1895 = vmatpush3.bf16.msra.mxu0 %v1892_v45 }
 0x34b   : > { %1774 = vmatmul.mubr.msk.f32.vlgmr.msra.gmra.mrb[6].mxu0 %vm524_vm1, %v2490_v2 }
 0x41e   : > { %v1775_v47 = vpop.f32.mrb[6].mxu0 }
 0x41f   : > { %v1365_v48 = vadd.f32 %v1775_v47, %v1528_v46  ;;  %v1346_v49 = vpop.f32.mrb[7].mxu0 }
 0x420   : > { %v1364_v50 = vadd.f32 %v1528_v46, %v1346_v49 }
 0x421   : > { %v1367_v51 = vmul.f32 0.1, %v1365_v48 }
 0x422   : > { %v1366_v52 = vmul.f32 0.1, %v1364_v50 }
 0x423   : > { %v1369_v53 = vadd.f32 %v1367_v51, %v2460_v30 }
 0x424   : > { %v1368_v54 = vadd.f32 %v1366_v52, %v2453_v16 }
 0x425   : > { %1371 = vst.msk [vmem:[%s341_s13 + $0x8] sm:$0xff] %vm355_vm0, %v1369_v53 }
 0x426   : > { %1370 = vst.msk [vmem:[%s341_s13] sm:$0xff] %vm355_vm0, %v1368_v54 }
 0x427   : > { %2112 = shalt.err (!%p2109_p4)
}
 0x428   : > { %s2113_s10 = scalar_lea.hbm %s2525_s25, 256  ;;  %s2117_s30 = scalar_lea.hbm %s2581_s7, 512 }
 0x429   : > { %p2114_p9 = scmp.ne.s32.totalorder %s2525_s25, %s2113_s10  ;;  %p2118_p8 = scmp.lt.u32.totalorder %s2525_s25, %s2581_s7 }
 0x42a   : > { %p2119_p13 = scmp.lt.u32.totalorder %s2117_s30, %s2113_s10  ;;  %p2121_p10 = scmp.lt.u32.totalorder %s2113_s10, %s2525_s25 }
 0x42b   : > { %p2115_p0 = pnand %p2114_p9, %p2381_p5 }
 0x42c   : > { %p2120_p6 = por %p2119_p13, %p2118_p8 }
 0x42d   : > { %p2116_p11 = pneg %p2115_p0 }
 0x42e   : > { %p2122_p3 = por %p2121_p10, %p2120_p6 }
 0x430   : > { %p2123_p7 = pnand %p2122_p3, %p2116_p11 }
 0x432   : > { %2126 = shalt.err (!%p2123_p7)
}
 0x433   : > { %s2182_s22 = smov 128   ;;  %s2183_s17 = smov 8  }
 0x434   : > { %1918 = dma.vmem_to_hbm [thread:$0]  (%p2381_p5), %s2527_s21, 256, %s2525_s25, %s1373_s4, %s2182_s22, %s2182_s22, %s2183_s17  }
 0x435 PF: > { %s1401_s24 = sand.u32 1, %s2161_s26   ;;  %p2599_p12 = scmp.ne.s32.totalorder %s2586_s9, 0 }
 0x436   : > { %p2600_p1 = scmp.ge.s32.totalorder %s2173_s29, 2  ;;  %s1402_s12 = scalar_lea.sflag [#allocation5], %s1401_s24 }
 0x438   : > { %p1935_p2 = pnand %p2600_p1, %p2599_p12 }
 0x43a   : > { %2156 = dma.done.wait (!%p1935_p2), %s1402_s12, 256  }
 0x43b   : > { %2158 = vsyncadd (!%p1935_p2), %s1402_s12, 4294967040  ;;  %p23_p4 = scmp.ge.s32.totalorder %s2367_s23, 4   ;;  %s2601_s26 = smov %s2165_s27 }
 0x43c   : > { %s2602_s27 = smov %s2169_s28  ;;  %s2603_s28 = smov %s2377_s19 }
 0x43d   : > { %s2604_s29 = smov %s2367_s23  ;;  %25 = sbr.rel (!%p23_p4) target bundleno = 9 (0x9), region = 111 }
 0x444   :  { %1407 = vsyncpa [#allocation4], 1 }
 0x445   :  { %1409 = vsyncpa [#allocation4 + $0x1], 1 }
 0x446   :  { %1410 = vsyncpa [#allocation7], 1 }
 0x447   :  { %1411 = vsyncpa [#allocation10], 1 }
 0x448   :  { %1412 = vsyncpa [#allocation5], 1 }
 0x449   :  { %1414 = vsyncpa [#allocation5 + $0x1], 1 }

</bundles_post_ra>
